<compile_context>
chip_gen: v5e
topology: v5e:2x2
jax: 0.10.0
libtpu: 0.0.40
codegen_flags: <defaults>
</compile_context>

<pallas_src>
import functools

import jax
import jax.numpy as jnp
from jax import lax
from jax.experimental import pallas as pl
from jax.experimental.pallas import tpu as pltpu


def _lstm_recurrence_kernel(gx_ref, h0_ref, c0_ref, whh_ref,
                            h_out_ref, c_out_ref):
    """One grid step = T_BLK sequential LSTM time steps.

    gx_ref : (T_BLK, B, 4H) f32  precomputed x_t @ W_ih^T + (b_ih + b_hh),
                                 gate columns ordered [i, f, o, g]
    whh_ref: (H, 4H)        bf16 recurrent weights (same gate column order)
    h_out_ref / c_out_ref : (B, H) f32 -- also the recurrent carry (resident
                                 across the grid because the output index_map
                                 is constant).
    """
    t_blk = gx_ref.shape[0]
    H = h0_ref.shape[-1]
    tb = pl.program_id(0)

    # Initialize the carry from (h0, c0) on the first time block.
    @pl.when(tb == 0)
    def _():
        h_out_ref[...] = h0_ref[...]
        c_out_ref[...] = c0_ref[...]

    w_hh = whh_ref[...]                                   # (H, 4H) bf16, once

    def step(i, carry):
        h_prev, c_prev = carry                            # f32 (B, H)
        gates = gx_ref[i] + jnp.dot(                      # (B, 4H) f32
            h_prev.astype(w_hh.dtype), w_hh,
            preferred_element_type=jnp.float32)
        sig = jax.nn.sigmoid(gates[:, :3 * H])            # [i | f | o] in one pass
        g_g = jnp.tanh(gates[:, 3 * H:])                  # cell candidate
        i_g = sig[:, :H]
        f_g = sig[:, H:2 * H]
        o_g = sig[:, 2 * H:]
        c_new = f_g * c_prev + i_g * g_g
        h_new = o_g * jnp.tanh(c_new)
        return h_new, c_new

    h, c = lax.fori_loop(0, t_blk, step,
                         (h_out_ref[...], c_out_ref[...]), unroll=True)
    h_out_ref[...] = h
    c_out_ref[...] = c


def _reorder_gate_cols(a, H):
    """Permute the last axis from PyTorch gate order [i, f, g, o] to [i, f, o, g]."""
    return jnp.concatenate(
        [a[..., :2 * H], a[..., 3 * H:], a[..., 2 * H:3 * H]], axis=-1)


def _pick_time_block(S, cap=16):
    for t in range(min(S, cap), 0, -1):
        if S % t == 0:
            return t
    return 1


@functools.partial(jax.jit, static_argnames=("t_blk",))
def lstm_forward(x, h0, c0, w_ih, w_hh, b_ih, b_hh, *, t_blk=None):
    """x: (batch, seq, d_in); h0, c0: (batch, d_hid).

    w_ih: (4H, d_in), w_hh: (4H, H), b_ih/b_hh: (4H,)  (PyTorch LSTMCell shapes)
    Returns (h_T, c_T), each (batch, d_hid), matching nn.LSTMCell iterated
    over dim=1 of `x`.
    """
    B, S, D = x.shape
    H = h0.shape[-1]
    G = 4 * H

    if S == 0:
        return h0.astype(jnp.float32), c0.astype(jnp.float32)

    if t_blk is None:
        t_blk = _pick_time_block(S)
    n_tb = S // t_blk

    # --- Parameter prep: gate reorder [i,f,g,o] -> [i,f,o,g]; bf16 weights. ---
    wih_t = _reorder_gate_cols(jnp.transpose(w_ih), H).astype(jnp.bfloat16)  # (D, 4H)
    whh_t = _reorder_gate_cols(jnp.transpose(w_hh), H).astype(jnp.bfloat16)  # (H, 4H)
    bias = _reorder_gate_cols(
        (b_ih + b_hh).reshape(1, G), H).astype(jnp.float32)                  # (1, 4H)

    # --- Hoisted input projection: one big, MXU-friendly matmul over all
    # time steps (bf16 operands, f32 accumulation), done outside the serial
    # recurrence as recommended. ---
    x_tm = jnp.transpose(x, (1, 0, 2))                        # (S, B, D) time-major
    gx = jnp.dot(x_tm.reshape(S * B, D).astype(jnp.bfloat16), wih_t,
                 preferred_element_type=jnp.float32)          # (S*B, 4H) f32
    gx = (gx + bias).reshape(S, B, G)

    grid_spec = pltpu.PrefetchScalarGridSpec(
        num_scalar_prefetch=0,
        grid=(n_tb,),
        in_specs=[
            pl.BlockSpec((t_blk, B, G), lambda tb: (tb, 0, 0)),   # gx time block
            pl.BlockSpec((B, H), lambda tb: (0, 0)),              # h0
            pl.BlockSpec((B, H), lambda tb: (0, 0)),              # c0
            pl.BlockSpec((H, G), lambda tb: (0, 0)),              # W_hh^T (bf16)
        ],
        out_specs=[
            pl.BlockSpec((B, H), lambda tb: (0, 0)),              # h_T (carry)
            pl.BlockSpec((B, H), lambda tb: (0, 0)),              # c_T (carry)
        ],
    )

    h_T, c_T = pl.pallas_call(
        _lstm_recurrence_kernel,
        out_shape=(
            jax.ShapeDtypeStruct((B, H), jnp.float32),
            jax.ShapeDtypeStruct((B, H), jnp.float32),
        ),
        grid_spec=grid_spec,
        compiler_params=pltpu.CompilerParams(
            dimension_semantics=("arbitrary",),        # time recurrence is serial
            vmem_limit_bytes=64 * 1024 * 1024,
        ),
    )(gx, h0.astype(jnp.float32), c0.astype(jnp.float32), whh_t)

    return h_T, c_T


def _reference_lstm(x, h0, c0, w_ih, w_hh, b_ih, b_hh):
    """Pure-JAX f32 reference matching torch.nn.LSTMCell applied over dim=1."""
    H = h0.shape[-1]
    h, c = h0, c0
    for t in range(x.shape[1]):
        x_t = x[:, t, :]
        gates = x_t @ w_ih.T + b_ih + h @ w_hh.T + b_hh
        i = jax.nn.sigmoid(gates[:, 0 * H:1 * H])
        f = jax.nn.sigmoid(gates[:, 1 * H:2 * H])
        g = jnp.tanh(gates[:, 2 * H:3 * H])
        o = jax.nn.sigmoid(gates[:, 3 * H:4 * H])
        c = f * c + i * g
        h = o * jnp.tanh(c)
    return h, c


if __name__ == "__main__":
    B, S, D, H = 4, 8, 16, 32

    key = jax.random.PRNGKey(0)
    kx, kh, kc, k1, k2, k3, k4 = jax.random.split(key, 7)

    x = jax.random.normal(kx, (B, S, D), dtype=jnp.float32)
    h0 = jax.random.normal(kh, (B, H), dtype=jnp.float32)
    c0 = jax.random.normal(kc, (B, H), dtype=jnp.float32)

    # Deterministic parameter init, PyTorch-style U(-1/sqrt(H), 1/sqrt(H)).
    bound = 1.0 / (H ** 0.5)
    w_ih = jax.random.uniform(k1, (4 * H, D), jnp.float32, -bound, bound)
    w_hh = jax.random.uniform(k2, (4 * H, H), jnp.float32, -bound, bound)
    b_ih = jax.random.uniform(k3, (4 * H,), jnp.float32, -bound, bound)
    b_hh = jax.random.uniform(k4, (4 * H,), jnp.float32, -bound, bound)

    h_out, c_out = lstm_forward(x, h0, c0, w_ih, w_hh, b_ih, b_hh)
    jax.block_until_ready((h_out, c_out))

    h_ref, c_ref = _reference_lstm(x, h0, c0, w_ih, w_hh, b_ih, b_hh)

    # bf16 MXU operands with f32 accumulation / f32 state: loose-ish tolerance.
    assert jnp.allclose(h_out, h_ref, atol=2e-2, rtol=2e-2), "h mismatch"
    assert jnp.allclose(c_out, c_ref, atol=2e-2, rtol=2e-2), "c mismatch"

    print("KERNEL_OK")
</pallas_src>

<mosaic_0001>
module attributes {stable_mosaic.version = 11 : i64} {
  func.func @_lstm_recurrence_kernel(%arg0: i32, %arg1: memref<8x4x128xf32, #tpu.memory_space<vmem>>, %arg2: memref<4x32xf32, #tpu.memory_space<vmem>>, %arg3: memref<4x32xf32, #tpu.memory_space<vmem>>, %arg4: memref<32x128xbf16, #tpu.memory_space<vmem>>, %arg5: memref<4x32xf32, #tpu.memory_space<vmem>>, %arg6: memref<4x32xf32, #tpu.memory_space<vmem>>) attributes {dimension_semantics = [#tpu.dimension_semantics<arbitrary>], iteration_bounds = array<i64: 1>, scalar_prefetch = 0 : i64, scratch_operands = 0 : i64, tpu.core_type = #tpu.core_type<tc>, window_params = [{transform_indices = @transform_0, window_bounds = array<i64: 8, 4, 128>}, {pipeline_mode = #tpu.pipeline_mode<synchronous>, transform_indices = @transform_1, window_bounds = array<i64: 4, 32>}, {pipeline_mode = #tpu.pipeline_mode<synchronous>, transform_indices = @transform_2, window_bounds = array<i64: 4, 32>}, {pipeline_mode = #tpu.pipeline_mode<synchronous>, transform_indices = @transform_3, window_bounds = array<i64: 32, 128>}, {pipeline_mode = #tpu.pipeline_mode<synchronous>, transform_indices = @transform_4, window_bounds = array<i64: 4, 32>}, {pipeline_mode = #tpu.pipeline_mode<synchronous>, transform_indices = @transform_5, window_bounds = array<i64: 4, 32>}]} {
    %c0_i32 = arith.constant 0 : i32
    %0 = arith.cmpi eq, %arg0, %c0_i32 : i32
    %1 = arith.extui %0 : i1 to i32
    %c0_i32_0 = arith.constant 0 : i32
    %2 = arith.cmpi ne, %1, %c0_i32_0 : i32
    scf.if %2 {
      %c0_42 = arith.constant 0 : index
      %c0_43 = arith.constant 0 : index
      %184 = vector.load %arg2[%c0_42, %c0_43] : memref<4x32xf32, #tpu.memory_space<vmem>>, vector<4x32xf32>
      %c0_44 = arith.constant 0 : index
      %c0_45 = arith.constant 0 : index
      %185 = vector.load %arg5[%c0_44, %c0_45] : memref<4x32xf32, #tpu.memory_space<vmem>>, vector<4x32xf32>
      tpu.vector_store %arg5[%c0_44, %c0_45], %184 {strides = array<i32>} : memref<4x32xf32, #tpu.memory_space<vmem>>, vector<4x32xf32>,
      %c0_46 = arith.constant 0 : index
      %c0_47 = arith.constant 0 : index
      %186 = vector.load %arg3[%c0_46, %c0_47] : memref<4x32xf32, #tpu.memory_space<vmem>>, vector<4x32xf32>
      %c0_48 = arith.constant 0 : index
      %c0_49 = arith.constant 0 : index
      %187 = vector.load %arg6[%c0_48, %c0_49] : memref<4x32xf32, #tpu.memory_space<vmem>>, vector<4x32xf32>
      tpu.vector_store %arg6[%c0_48, %c0_49], %186 {strides = array<i32>} : memref<4x32xf32, #tpu.memory_space<vmem>>, vector<4x32xf32>,
    } else {
    }
    %c0 = arith.constant 0 : index
    %c0_1 = arith.constant 0 : index
    %3 = vector.load %arg4[%c0, %c0_1] : memref<32x128xbf16, #tpu.memory_space<vmem>>, vector<32x128xbf16>
    %c0_2 = arith.constant 0 : index
    %c0_3 = arith.constant 0 : index
    %4 = vector.load %arg5[%c0_2, %c0_3] : memref<4x32xf32, #tpu.memory_space<vmem>>, vector<4x32xf32>
    %c0_4 = arith.constant 0 : index
    %c0_5 = arith.constant 0 : index
    %5 = vector.load %arg6[%c0_4, %c0_5] : memref<4x32xf32, #tpu.memory_space<vmem>>, vector<4x32xf32>
    %c0_i32_6 = arith.constant 0 : i32
    %6 = arith.index_cast %c0_i32_6 : i32 to index
    %c0_7 = arith.constant 0 : index
    %c0_8 = arith.constant 0 : index
    %7 = vector.load %arg1[%6, %c0_7, %c0_8] : memref<8x4x128xf32, #tpu.memory_space<vmem>>, vector<1x4x128xf32>
    %8 = vector.shape_cast %7 : vector<1x4x128xf32> to vector<4x128xf32>
    %9 = arith.truncf %4 : vector<4x32xf32> to vector<4x32xbf16>
    %cst = arith.constant dense<0.000000e+00> : vector<4x128xf32>
    %10 = tpu.matmul %9, %3, %cst {dimension_numbers = #tpu.dot_dimension_numbers<[1], [0], [0], [1], [0, 0, 1, 1], [], []>} : vector<4x32xbf16>, vector<32x128xbf16>, vector<4x128xf32> -> vector<4x128xf32>
    %11 = arith.addf %8, %10 : vector<4x128xf32>
    %12 = vector.extract_strided_slice %11 {offsets = [0, 0], sizes = [4, 96], strides = [1, 1]} : vector<4x128xf32> to vector<4x96xf32>
    %13 = arith.negf %12 : vector<4x96xf32>
    %14 = math.exp %13 : vector<4x96xf32>
    %cst_9 = arith.constant 1.000000e+00 : f32
    %15 = vector.broadcast %cst_9 : f32 to vector<4x96xf32>
    %16 = arith.addf %15, %14 : vector<4x96xf32>
    %17 = arith.divf %15, %16 : vector<4x96xf32>
    %18 = vector.extract_strided_slice %11 {offsets = [0, 96], sizes = [4, 32], strides = [1, 1]} : vector<4x128xf32> to vector<4x32xf32>
    %19 = math.tanh %18 : vector<4x32xf32>
    %20 = vector.extract_strided_slice %17 {offsets = [0, 0], sizes = [4, 32], strides = [1, 1]} : vector<4x96xf32> to vector<4x32xf32>
    %21 = vector.extract_strided_slice %17 {offsets = [0, 32], sizes = [4, 32], strides = [1, 1]} : vector<4x96xf32> to vector<4x32xf32>
    %22 = vector.extract_strided_slice %17 {offsets = [0, 64], sizes = [4, 32], strides = [1, 1]} : vector<4x96xf32> to vector<4x32xf32>
    %23 = arith.mulf %21, %5 : vector<4x32xf32>
    %24 = arith.mulf %20, %19 : vector<4x32xf32>
    %25 = arith.addf %23, %24 : vector<4x32xf32>
    %26 = math.tanh %25 : vector<4x32xf32>
    %27 = arith.mulf %22, %26 : vector<4x32xf32>
    %c1_i32 = arith.constant 1 : i32
    %28 = arith.index_cast %c1_i32 : i32 to index
    %c0_10 = arith.constant 0 : index
    %c0_11 = arith.constant 0 : index
    %29 = vector.load %arg1[%28, %c0_10, %c0_11] : memref<8x4x128xf32, #tpu.memory_space<vmem>>, vector<1x4x128xf32>
    %30 = vector.shape_cast %29 : vector<1x4x128xf32> to vector<4x128xf32>
    %31 = arith.truncf %27 : vector<4x32xf32> to vector<4x32xbf16>
    %cst_12 = arith.constant dense<0.000000e+00> : vector<4x128xf32>
    %32 = tpu.matmul %31, %3, %cst_12 {dimension_numbers = #tpu.dot_dimension_numbers<[1], [0], [0], [1], [0, 0, 1, 1], [], []>} : vector<4x32xbf16>, vector<32x128xbf16>, vector<4x128xf32> -> vector<4x128xf32>
    %33 = arith.addf %30, %32 : vector<4x128xf32>
    %34 = vector.extract_strided_slice %33 {offsets = [0, 0], sizes = [4, 96], strides = [1, 1]} : vector<4x128xf32> to vector<4x96xf32>
    %35 = arith.negf %34 : vector<4x96xf32>
    %36 = math.exp %35 : vector<4x96xf32>
    %cst_13 = arith.constant 1.000000e+00 : f32
    %37 = vector.broadcast %cst_13 : f32 to vector<4x96xf32>
    %38 = arith.addf %37, %36 : vector<4x96xf32>
    %39 = arith.divf %37, %38 : vector<4x96xf32>
    %40 = vector.extract_strided_slice %33 {offsets = [0, 96], sizes = [4, 32], strides = [1, 1]} : vector<4x128xf32> to vector<4x32xf32>
    %41 = math.tanh %40 : vector<4x32xf32>
    %42 = vector.extract_strided_slice %39 {offsets = [0, 0], sizes = [4, 32], strides = [1, 1]} : vector<4x96xf32> to vector<4x32xf32>
    %43 = vector.extract_strided_slice %39 {offsets = [0, 32], sizes = [4, 32], strides = [1, 1]} : vector<4x96xf32> to vector<4x32xf32>
    %44 = vector.extract_strided_slice %39 {offsets = [0, 64], sizes = [4, 32], strides = [1, 1]} : vector<4x96xf32> to vector<4x32xf32>
    %45 = arith.mulf %43, %25 : vector<4x32xf32>
    %46 = arith.mulf %42, %41 : vector<4x32xf32>
    %47 = arith.addf %45, %46 : vector<4x32xf32>
    %48 = math.tanh %47 : vector<4x32xf32>
    %49 = arith.mulf %44, %48 : vector<4x32xf32>
    %c2_i32 = arith.constant 2 : i32
    %50 = arith.index_cast %c2_i32 : i32 to index
    %c0_14 = arith.constant 0 : index
    %c0_15 = arith.constant 0 : index
    %51 = vector.load %arg1[%50, %c0_14, %c0_15] : memref<8x4x128xf32, #tpu.memory_space<vmem>>, vector<1x4x128xf32>
    %52 = vector.shape_cast %51 : vector<1x4x128xf32> to vector<4x128xf32>
    %53 = arith.truncf %49 : vector<4x32xf32> to vector<4x32xbf16>
    %cst_16 = arith.constant dense<0.000000e+00> : vector<4x128xf32>
    %54 = tpu.matmul %53, %3, %cst_16 {dimension_numbers = #tpu.dot_dimension_numbers<[1], [0], [0], [1], [0, 0, 1, 1], [], []>} : vector<4x32xbf16>, vector<32x128xbf16>, vector<4x128xf32> -> vector<4x128xf32>
    %55 = arith.addf %52, %54 : vector<4x128xf32>
    %56 = vector.extract_strided_slice %55 {offsets = [0, 0], sizes = [4, 96], strides = [1, 1]} : vector<4x128xf32> to vector<4x96xf32>
    %57 = arith.negf %56 : vector<4x96xf32>
    %58 = math.exp %57 : vector<4x96xf32>
    %cst_17 = arith.constant 1.000000e+00 : f32
    %59 = vector.broadcast %cst_17 : f32 to vector<4x96xf32>
    %60 = arith.addf %59, %58 : vector<4x96xf32>
    %61 = arith.divf %59, %60 : vector<4x96xf32>
    %62 = vector.extract_strided_slice %55 {offsets = [0, 96], sizes = [4, 32], strides = [1, 1]} : vector<4x128xf32> to vector<4x32xf32>
    %63 = math.tanh %62 : vector<4x32xf32>
    %64 = vector.extract_strided_slice %61 {offsets = [0, 0], sizes = [4, 32], strides = [1, 1]} : vector<4x96xf32> to vector<4x32xf32>
    %65 = vector.extract_strided_slice %61 {offsets = [0, 32], sizes = [4, 32], strides = [1, 1]} : vector<4x96xf32> to vector<4x32xf32>
    %66 = vector.extract_strided_slice %61 {offsets = [0, 64], sizes = [4, 32], strides = [1, 1]} : vector<4x96xf32> to vector<4x32xf32>
    %67 = arith.mulf %65, %47 : vector<4x32xf32>
    %68 = arith.mulf %64, %63 : vector<4x32xf32>
    %69 = arith.addf %67, %68 : vector<4x32xf32>
    %70 = math.tanh %69 : vector<4x32xf32>
    %71 = arith.mulf %66, %70 : vector<4x32xf32>
    %c3_i32 = arith.constant 3 : i32
    %72 = arith.index_cast %c3_i32 : i32 to index
    %c0_18 = arith.constant 0 : index
    %c0_19 = arith.constant 0 : index
    %73 = vector.load %arg1[%72, %c0_18, %c0_19] : memref<8x4x128xf32, #tpu.memory_space<vmem>>, vector<1x4x128xf32>
    %74 = vector.shape_cast %73 : vector<1x4x128xf32> to vector<4x128xf32>
    %75 = arith.truncf %71 : vector<4x32xf32> to vector<4x32xbf16>
    %cst_20 = arith.constant dense<0.000000e+00> : vector<4x128xf32>
    %76 = tpu.matmul %75, %3, %cst_20 {dimension_numbers = #tpu.dot_dimension_numbers<[1], [0], [0], [1], [0, 0, 1, 1], [], []>} : vector<4x32xbf16>, vector<32x128xbf16>, vector<4x128xf32> -> vector<4x128xf32>
    %77 = arith.addf %74, %76 : vector<4x128xf32>
    %78 = vector.extract_strided_slice %77 {offsets = [0, 0], sizes = [4, 96], strides = [1, 1]} : vector<4x128xf32> to vector<4x96xf32>
    %79 = arith.negf %78 : vector<4x96xf32>
    %80 = math.exp %79 : vector<4x96xf32>
    %cst_21 = arith.constant 1.000000e+00 : f32
    %81 = vector.broadcast %cst_21 : f32 to vector<4x96xf32>
    %82 = arith.addf %81, %80 : vector<4x96xf32>
    %83 = arith.divf %81, %82 : vector<4x96xf32>
    %84 = vector.extract_strided_slice %77 {offsets = [0, 96], sizes = [4, 32], strides = [1, 1]} : vector<4x128xf32> to vector<4x32xf32>
    %85 = math.tanh %84 : vector<4x32xf32>
    %86 = vector.extract_strided_slice %83 {offsets = [0, 0], sizes = [4, 32], strides = [1, 1]} : vector<4x96xf32> to vector<4x32xf32>
    %87 = vector.extract_strided_slice %83 {offsets = [0, 32], sizes = [4, 32], strides = [1, 1]} : vector<4x96xf32> to vector<4x32xf32>
    %88 = vector.extract_strided_slice %83 {offsets = [0, 64], sizes = [4, 32], strides = [1, 1]} : vector<4x96xf32> to vector<4x32xf32>
    %89 = arith.mulf %87, %69 : vector<4x32xf32>
    %90 = arith.mulf %86, %85 : vector<4x32xf32>
    %91 = arith.addf %89, %90 : vector<4x32xf32>
    %92 = math.tanh %91 : vector<4x32xf32>
    %93 = arith.mulf %88, %92 : vector<4x32xf32>
    %c4_i32 = arith.constant 4 : i32
    %94 = arith.index_cast %c4_i32 : i32 to index
    %c0_22 = arith.constant 0 : index
    %c0_23 = arith.constant 0 : index
    %95 = vector.load %arg1[%94, %c0_22, %c0_23] : memref<8x4x128xf32, #tpu.memory_space<vmem>>, vector<1x4x128xf32>
    %96 = vector.shape_cast %95 : vector<1x4x128xf32> to vector<4x128xf32>
    %97 = arith.truncf %93 : vector<4x32xf32> to vector<4x32xbf16>
    %cst_24 = arith.constant dense<0.000000e+00> : vector<4x128xf32>
    %98 = tpu.matmul %97, %3, %cst_24 {dimension_numbers = #tpu.dot_dimension_numbers<[1], [0], [0], [1], [0, 0, 1, 1], [], []>} : vector<4x32xbf16>, vector<32x128xbf16>, vector<4x128xf32> -> vector<4x128xf32>
    %99 = arith.addf %96, %98 : vector<4x128xf32>
    %100 = vector.extract_strided_slice %99 {offsets = [0, 0], sizes = [4, 96], strides = [1, 1]} : vector<4x128xf32> to vector<4x96xf32>
    %101 = arith.negf %100 : vector<4x96xf32>
    %102 = math.exp %101 : vector<4x96xf32>
    %cst_25 = arith.constant 1.000000e+00 : f32
    %103 = vector.broadcast %cst_25 : f32 to vector<4x96xf32>
    %104 = arith.addf %103, %102 : vector<4x96xf32>
    %105 = arith.divf %103, %104 : vector<4x96xf32>
    %106 = vector.extract_strided_slice %99 {offsets = [0, 96], sizes = [4, 32], strides = [1, 1]} : vector<4x128xf32> to vector<4x32xf32>
    %107 = math.tanh %106 : vector<4x32xf32>
    %108 = vector.extract_strided_slice %105 {offsets = [0, 0], sizes = [4, 32], strides = [1, 1]} : vector<4x96xf32> to vector<4x32xf32>
    %109 = vector.extract_strided_slice %105 {offsets = [0, 32], sizes = [4, 32], strides = [1, 1]} : vector<4x96xf32> to vector<4x32xf32>
    %110 = vector.extract_strided_slice %105 {offsets = [0, 64], sizes = [4, 32], strides = [1, 1]} : vector<4x96xf32> to vector<4x32xf32>
    %111 = arith.mulf %109, %91 : vector<4x32xf32>
    %112 = arith.mulf %108, %107 : vector<4x32xf32>
    %113 = arith.addf %111, %112 : vector<4x32xf32>
    %114 = math.tanh %113 : vector<4x32xf32>
    %115 = arith.mulf %110, %114 : vector<4x32xf32>
    %c5_i32 = arith.constant 5 : i32
    %116 = arith.index_cast %c5_i32 : i32 to index
    %c0_26 = arith.constant 0 : index
    %c0_27 = arith.constant 0 : index
    %117 = vector.load %arg1[%116, %c0_26, %c0_27] : memref<8x4x128xf32, #tpu.memory_space<vmem>>, vector<1x4x128xf32>
    %118 = vector.shape_cast %117 : vector<1x4x128xf32> to vector<4x128xf32>
    %119 = arith.truncf %115 : vector<4x32xf32> to vector<4x32xbf16>
    %cst_28 = arith.constant dense<0.000000e+00> : vector<4x128xf32>
    %120 = tpu.matmul %119, %3, %cst_28 {dimension_numbers = #tpu.dot_dimension_numbers<[1], [0], [0], [1], [0, 0, 1, 1], [], []>} : vector<4x32xbf16>, vector<32x128xbf16>, vector<4x128xf32> -> vector<4x128xf32>
    %121 = arith.addf %118, %120 : vector<4x128xf32>
    %122 = vector.extract_strided_slice %121 {offsets = [0, 0], sizes = [4, 96], strides = [1, 1]} : vector<4x128xf32> to vector<4x96xf32>
    %123 = arith.negf %122 : vector<4x96xf32>
    %124 = math.exp %123 : vector<4x96xf32>
    %cst_29 = arith.constant 1.000000e+00 : f32
    %125 = vector.broadcast %cst_29 : f32 to vector<4x96xf32>
    %126 = arith.addf %125, %124 : vector<4x96xf32>
    %127 = arith.divf %125, %126 : vector<4x96xf32>
    %128 = vector.extract_strided_slice %121 {offsets = [0, 96], sizes = [4, 32], strides = [1, 1]} : vector<4x128xf32> to vector<4x32xf32>
    %129 = math.tanh %128 : vector<4x32xf32>
    %130 = vector.extract_strided_slice %127 {offsets = [0, 0], sizes = [4, 32], strides = [1, 1]} : vector<4x96xf32> to vector<4x32xf32>
    %131 = vector.extract_strided_slice %127 {offsets = [0, 32], sizes = [4, 32], strides = [1, 1]} : vector<4x96xf32> to vector<4x32xf32>
    %132 = vector.extract_strided_slice %127 {offsets = [0, 64], sizes = [4, 32], strides = [1, 1]} : vector<4x96xf32> to vector<4x32xf32>
    %133 = arith.mulf %131, %113 : vector<4x32xf32>
    %134 = arith.mulf %130, %129 : vector<4x32xf32>
    %135 = arith.addf %133, %134 : vector<4x32xf32>
    %136 = math.tanh %135 : vector<4x32xf32>
    %137 = arith.mulf %132, %136 : vector<4x32xf32>
    %c6_i32 = arith.constant 6 : i32
    %138 = arith.index_cast %c6_i32 : i32 to index
    %c0_30 = arith.constant 0 : index
    %c0_31 = arith.constant 0 : index
    %139 = vector.load %arg1[%138, %c0_30, %c0_31] : memref<8x4x128xf32, #tpu.memory_space<vmem>>, vector<1x4x128xf32>
    %140 = vector.shape_cast %139 : vector<1x4x128xf32> to vector<4x128xf32>
    %141 = arith.truncf %137 : vector<4x32xf32> to vector<4x32xbf16>
    %cst_32 = arith.constant dense<0.000000e+00> : vector<4x128xf32>
    %142 = tpu.matmul %141, %3, %cst_32 {dimension_numbers = #tpu.dot_dimension_numbers<[1], [0], [0], [1], [0, 0, 1, 1], [], []>} : vector<4x32xbf16>, vector<32x128xbf16>, vector<4x128xf32> -> vector<4x128xf32>
    %143 = arith.addf %140, %142 : vector<4x128xf32>
    %144 = vector.extract_strided_slice %143 {offsets = [0, 0], sizes = [4, 96], strides = [1, 1]} : vector<4x128xf32> to vector<4x96xf32>
    %145 = arith.negf %144 : vector<4x96xf32>
    %146 = math.exp %145 : vector<4x96xf32>
    %cst_33 = arith.constant 1.000000e+00 : f32
    %147 = vector.broadcast %cst_33 : f32 to vector<4x96xf32>
    %148 = arith.addf %147, %146 : vector<4x96xf32>
    %149 = arith.divf %147, %148 : vector<4x96xf32>
    %150 = vector.extract_strided_slice %143 {offsets = [0, 96], sizes = [4, 32], strides = [1, 1]} : vector<4x128xf32> to vector<4x32xf32>
    %151 = math.tanh %150 : vector<4x32xf32>
    %152 = vector.extract_strided_slice %149 {offsets = [0, 0], sizes = [4, 32], strides = [1, 1]} : vector<4x96xf32> to vector<4x32xf32>
    %153 = vector.extract_strided_slice %149 {offsets = [0, 32], sizes = [4, 32], strides = [1, 1]} : vector<4x96xf32> to vector<4x32xf32>
    %154 = vector.extract_strided_slice %149 {offsets = [0, 64], sizes = [4, 32], strides = [1, 1]} : vector<4x96xf32> to vector<4x32xf32>
    %155 = arith.mulf %153, %135 : vector<4x32xf32>
    %156 = arith.mulf %152, %151 : vector<4x32xf32>
    %157 = arith.addf %155, %156 : vector<4x32xf32>
    %158 = math.tanh %157 : vector<4x32xf32>
    %159 = arith.mulf %154, %158 : vector<4x32xf32>
    %c7_i32 = arith.constant 7 : i32
    %160 = arith.index_cast %c7_i32 : i32 to index
    %c0_34 = arith.constant 0 : index
    %c0_35 = arith.constant 0 : index
    %161 = vector.load %arg1[%160, %c0_34, %c0_35] : memref<8x4x128xf32, #tpu.memory_space<vmem>>, vector<1x4x128xf32>
    %162 = vector.shape_cast %161 : vector<1x4x128xf32> to vector<4x128xf32>
    %163 = arith.truncf %159 : vector<4x32xf32> to vector<4x32xbf16>
    %cst_36 = arith.constant dense<0.000000e+00> : vector<4x128xf32>
    %164 = tpu.matmul %163, %3, %cst_36 {dimension_numbers = #tpu.dot_dimension_numbers<[1], [0], [0], [1], [0, 0, 1, 1], [], []>} : vector<4x32xbf16>, vector<32x128xbf16>, vector<4x128xf32> -> vector<4x128xf32>
    %165 = arith.addf %162, %164 : vector<4x128xf32>
    %166 = vector.extract_strided_slice %165 {offsets = [0, 0], sizes = [4, 96], strides = [1, 1]} : vector<4x128xf32> to vector<4x96xf32>
    %167 = arith.negf %166 : vector<4x96xf32>
    %168 = math.exp %167 : vector<4x96xf32>
    %cst_37 = arith.constant 1.000000e+00 : f32
    %169 = vector.broadcast %cst_37 : f32 to vector<4x96xf32>
    %170 = arith.addf %169, %168 : vector<4x96xf32>
    %171 = arith.divf %169, %170 : vector<4x96xf32>
    %172 = vector.extract_strided_slice %165 {offsets = [0, 96], sizes = [4, 32], strides = [1, 1]} : vector<4x128xf32> to vector<4x32xf32>
    %173 = math.tanh %172 : vector<4x32xf32>
    %174 = vector.extract_strided_slice %171 {offsets = [0, 0], sizes = [4, 32], strides = [1, 1]} : vector<4x96xf32> to vector<4x32xf32>
    %175 = vector.extract_strided_slice %171 {offsets = [0, 32], sizes = [4, 32], strides = [1, 1]} : vector<4x96xf32> to vector<4x32xf32>
    %176 = vector.extract_strided_slice %171 {offsets = [0, 64], sizes = [4, 32], strides = [1, 1]} : vector<4x96xf32> to vector<4x32xf32>
    %177 = arith.mulf %175, %157 : vector<4x32xf32>
    %178 = arith.mulf %174, %173 : vector<4x32xf32>
    %179 = arith.addf %177, %178 : vector<4x32xf32>
    %180 = math.tanh %179 : vector<4x32xf32>
    %181 = arith.mulf %176, %180 : vector<4x32xf32>
    %c8_i32 = arith.constant 8 : i32
    %c0_38 = arith.constant 0 : index
    %c0_39 = arith.constant 0 : index
    %182 = vector.load %arg5[%c0_38, %c0_39] : memref<4x32xf32, #tpu.memory_space<vmem>>, vector<4x32xf32>
    tpu.vector_store %arg5[%c0_38, %c0_39], %181 {strides = array<i32>} : memref<4x32xf32, #tpu.memory_space<vmem>>, vector<4x32xf32>,
    %c0_40 = arith.constant 0 : index
    %c0_41 = arith.constant 0 : index
    %183 = vector.load %arg6[%c0_40, %c0_41] : memref<4x32xf32, #tpu.memory_space<vmem>>, vector<4x32xf32>
    tpu.vector_store %arg6[%c0_40, %c0_41], %179 {strides = array<i32>} : memref<4x32xf32, #tpu.memory_space<vmem>>, vector<4x32xf32>,
    return
  }
  func.func @transform_0(%arg0: i32) -> (i32, i32, i32) {
    %c0_i32 = arith.constant 0 : i32
    %c0_i32_0 = arith.constant 0 : i32
    %c0_i32_1 = arith.constant 0 : i32
    return %arg0, %c0_i32, %c0_i32_0 : i32, i32, i32
  }
  func.func @transform_1(%arg0: i32) -> (i32, i32) {
    %c0_i32 = arith.constant 0 : i32
    %c0_i32_0 = arith.constant 0 : i32
    %c0_i32_1 = arith.constant 0 : i32
    return %c0_i32, %c0_i32_0 : i32, i32
  }
  func.func @transform_2(%arg0: i32) -> (i32, i32) {
    %c0_i32 = arith.constant 0 : i32
    %c0_i32_0 = arith.constant 0 : i32
    %c0_i32_1 = arith.constant 0 : i32
    return %c0_i32, %c0_i32_0 : i32, i32
  }
  func.func @transform_3(%arg0: i32) -> (i32, i32) {
    %c0_i32 = arith.constant 0 : i32
    %c0_i32_0 = arith.constant 0 : i32
    %c0_i32_1 = arith.constant 0 : i32
    return %c0_i32, %c0_i32_0 : i32, i32
  }
  func.func @transform_4(%arg0: i32) -> (i32, i32) {
    %c0_i32 = arith.constant 0 : i32
    %c0_i32_0 = arith.constant 0 : i32
    %c0_i32_1 = arith.constant 0 : i32
    return %c0_i32, %c0_i32_0 : i32, i32
  }
  func.func @transform_5(%arg0: i32) -> (i32, i32) {
    %c0_i32 = arith.constant 0 : i32
    %c0_i32_0 = arith.constant 0 : i32
    %c0_i32_1 = arith.constant 0 : i32
    return %c0_i32, %c0_i32_0 : i32, i32
  }
}

</mosaic_0001>

<bundles_post_ra>
// kernel: lstm_forward.1
= control target key start
LH: loop header
LB: loop body
LE: loop exit
PB: predicated region body
PF: predicated region fallthrough
CT: control target
= control target key end

     0   :  { %11 = vsyncpa [#allocation3], 0  ;;  %vm27_vm0 = vcmask 257024   ;;  %s849_s0 = inlined_call_operand.vmem [shape: f32[8,4,128], index: 0, kind: input, shape index: {}]   ;;  %s850_s1 = inlined_call_operand.vmem [shape: f32[4,32], index: 1, kind: input, shape index: {}]   ;;  %s851_s2 = inlined_call_operand.vmem [shape: f32[4,32], index: 2, kind: input, shape index: {}]   ;;  %s852_s3 = inlined_call_operand.vmem [shape: bf16[32,128], index: 3, kind: input, shape index: {}]   ;;  %s853_s4 = inlined_call_operand.hbm [shape: f32[4,32], index: 4, kind: output, shape index: {0}]   ;;  %s854_s5 = inlined_call_operand.hbm [shape: f32[4,32], index: 5, kind: output, shape index: {1}]  }
   0x1   :  { %v605_v0 = vld [vmem:[%s852_s3 + $0x8] sm:$0xff]  ;;  %v26_v1 = vld [vmem:[%s850_s1] sm:$0xf] }
   0x2   :  { %28 = vst.msk [vmem:[#allocation2] sm:$0xf] %vm27_vm0, %v26_v1 }
   0x3   :  { %12 = vsyncpa [#allocation5], 0  ;;  %61 = vmatpush.bf16.msra.mxu0 %v605_v0  ;;  %v604_v2 = vld [vmem:[%s852_s3] sm:$0xff]  ;;  %125 = vmatpush.bf16.msra.mxu1 %v605_v0  ;;  %vm51_vm1 = vcmask 261120   ;;  %s727_s26 = smov 32   ;;  %s730_s16 = smov [#allocation4]  }
   0x4   :  { %185 = vmatpush.bf16.msra.mxu2 %v605_v0  ;;  %245 = vmatpush.bf16.msra.mxu3 %v605_v0  ;;  %v29_v5 = vld [vmem:[%s851_s2] sm:$0xf]  ;;  %s728_s2 = smov 64   ;;  %v583_v36 = vld [vmem:[%s849_s0 + $0x4] sm:$0xf]  ;;  %s557_s17 = sshll.u32 %s730_s16, 4  ;;  %s558_s17 = int_to_ptr.vmem [resolvable:$true] %s557_s17 }
   0x5   :  { %30 = vst.msk [vmem:[#allocation4] sm:$0xf] %vm27_vm0, %v29_v5  ;;  %v37_v6 = vld [vmem:[%s849_s0] sm:$0xf]  ;;  %s559_s20 = sshll.u32 %s854_s5, 4  ;;  %s731_s21 = smov [#allocation2]   ;;  %s560_s20 = int_to_ptr.hbm [resolvable:$true] %s559_s20 }
   0x6   :  { %s546_s22 = sshll.u32 %s731_s21, 4  ;;  %s548_s3 = sshll.u32 %s853_s4, 4  ;;  %s547_s22 = int_to_ptr.vmem [resolvable:$true] %s546_s22  ;;  %s549_s3 = int_to_ptr.hbm [resolvable:$true] %s548_s3 }
   0x7   :  { %62 = vmatpush.bf16.msra.mxu0 %v604_v2  ;;  %126 = vmatpush.bf16.msra.mxu1 %v604_v2 }
   0x8   :  { %186 = vmatpush.bf16.msra.mxu2 %v604_v2  ;;  %246 = vmatpush.bf16.msra.mxu3 %v604_v2 }
   0x9   :  { %v35_v3 = vld [vmem:[#allocation2] sm:$0xf] }
   0xa   :  { %v38_v4 = vpack.c.bf16 %v35_v3, %v35_v3 }
   0xb   :  { %305 = vmatpush.bf16.msrb.mxu0 %v605_v0  ;;  %365 = vmatpush.bf16.msrb.mxu1 %v605_v0 }
   0xc   :  { %425 = vmatpush.bf16.msrb.mxu2 %v605_v0  ;;  %485 = vmatpush.bf16.msrb.mxu3 %v605_v0  ;;  %v36_v11 = vld [vmem:[#allocation4] sm:$0xf]  ;;  %v586_v0 = vld [vmem:[%s849_s0 + $0x8] sm:$0xf] }
   0xd   :  { %581 = vmatmul.msk.bf16.vlgmr.msra.gmra.mxu0 %vm51_vm1, %v38_v4 }
   0xf   :  { %306 = vmatpush.bf16.msrb.mxu0 %v604_v2  ;;  %366 = vmatpush.bf16.msrb.mxu1 %v604_v2 }
  0x10   :  { %426 = vmatpush.bf16.msrb.mxu2 %v604_v2  ;;  %486 = vmatpush.bf16.msrb.mxu3 %v604_v2 }
  0x8a   :  { %v64_v7 = vpop.f32.mrf.mxu0 }
  0x8b   :  { %v68_v8 = vadd.f32 %v64_v7, %v37_v6 }
  0x8d   :  { %611 = vtanh.f32 %v68_v8  ;;  %v582_v12 = vmul.f32 -1.442695, %v68_v8 }
  0x8f   :  { %613 = vpow2.f32 %v582_v12 }
  0x92   :  { %v66_v9 = vpop.f32.mrf.mxu0 }
  0x93   :  { %v612_v10 = vpop.eup %611 }
  0x94   :  { %95 = vrot.lane.b32.xlu0 %v612_v10, %s727_s26 }
  0x95   :  { %v614_v13 = vpop.eup %613 }
  0x96   :  { %v72_v14 = vadd.f32 1.0, %v614_v13 }
  0x98   :  { %615 = vrcp.f32 %v72_v14  ;;  %v84_v20 = vand.u32 2147483648, %v72_v14  ;;  %vm78_vm3 = vweird.f32 %v72_v14  ;;  %v82_v21 = vand.u32 2147483647, %v72_v14 }
  0x9a   :  { %v85_v23 = vor.u32 1.1754944e-38, %v84_v20  ;;  %vm83_vm5 = vcmp.eq.f32.partialorder %v82_v21, 8.507059e+37 }
  0x9c   :  { %90 = vrot.lane.b32.xlu0 %v36_v11, %s727_s26 }
  0x9e   :  { %v616_v15 = vpop.eup %615 }
  0x9f   :  { %v74_v16 = vmul.f32 %v616_v15, %v72_v14  ;;  %vm79_vm2 = vweird.f32 %v616_v15 }
  0xa0   :  { %vm80_vm4 = vmor %vm78_vm3, %vm79_vm2 }
  0xa1   :  { %v75_v17 = vsub.f32 1.0, %v74_v16 }
  0xa3   :  { %v76_v18 = vmul.f32 %v616_v15, %v75_v17 }
  0xa5   :  { %v77_v19 = vadd.f32 %v616_v15, %v76_v18 }
  0xa7   :  { %v81_v22 = vsel %vm80_vm4, %v616_v15, %v77_v19 }
  0xa8   :  { %v86_v25 = vsel %vm83_vm5, %v85_v23, %v81_v22 }
 0x106   :  { %v96_v24 = vpop.permute.xlu0 %95 }
 0x107   :  { %v98_v26 = vmul.f32 %v96_v24, %v86_v25 }
 0x109   :  { %100 = vrot.lane.b32.xlu1 %v98_v26, %s727_s26 }
 0x10e   :  { %v91_v27 = vpop.permute.xlu0 %90 }
 0x10f   :  { %v93_v28 = vmul.f32 %v91_v27, %v86_v25 }
 0x17b   :  { %v101_v29 = vpop.permute.xlu1 %100 }
 0x17c   :  { %v103_v30 = vadd.f32 %v101_v29, %v93_v28  ;;  %v589_v28 = vld [vmem:[%s849_s0 + $0xc] sm:$0xf] }
 0x17e   :  { %617 = vtanh.f32 %v103_v30 }
 0x184   :  { %v618_v31 = vpop.eup %617 }
 0x185   :  { %106 = vrot.lane.b32.xlu1 %v618_v31, %s727_s26 }
 0x1f7   :  { %v107_v32 = vpop.permute.xlu1 %106 }
 0x1f8   :  { %v109_v33 = vmul.f32 %v107_v32, %v86_v25 }
 0x1fa   :  { %v112_v34 = vpack.c.bf16 %v109_v33, %v109_v33 }
 0x1fc   :  { %114 = vrot.lane.b32.xlu2 %v112_v34, %s728_s2 }
 0x256   :  { %v115_v35 = vpop.permute.xlu2 %114 }
 0x257   :  { %584 = vmatmul.msk.bf16.vlgmr.msra.gmra.mxu1 %vm51_vm1, %v115_v35 }
 0x2d4   :  { %v128_v37 = vpop.f32.mrf.mxu1 }
 0x2d5   :  { %v132_v38 = vadd.f32 %v583_v36, %v128_v37 }
 0x2d7   :  { %619 = vtanh.f32 %v132_v38  ;;  %v585_v41 = vmul.f32 -1.442695, %v132_v38 }
 0x2d9   :  { %621 = vpow2.f32 %v585_v41 }
 0x2dc   :  { %v130_v39 = vpop.f32.mrf.mxu1 }
 0x2dd   :  { %v620_v40 = vpop.eup %619 }
 0x2de   :  { %155 = vrot.lane.b32.xlu2 %v620_v40, %s727_s26 }
 0x2df   :  { %v622_v42 = vpop.eup %621 }
 0x2e0   :  { %v136_v43 = vadd.f32 1.0, %v622_v42 }
 0x2e2   :  { %623 = vrcp.f32 %v136_v43  ;;  %v148_v49 = vand.u32 2147483648, %v136_v43  ;;  %vm142_vm7 = vweird.f32 %v136_v43  ;;  %v146_v50 = vand.u32 2147483647, %v136_v43 }
 0x2e4   :  { %v149_v52 = vor.u32 1.1754944e-38, %v148_v49  ;;  %vm147_vm9 = vcmp.eq.f32.partialorder %v146_v50, 8.507059e+37 }
 0x2e8   :  { %v624_v44 = vpop.eup %623 }
 0x2e9   :  { %v138_v45 = vmul.f32 %v624_v44, %v136_v43  ;;  %vm143_vm6 = vweird.f32 %v624_v44 }
 0x2ea   :  { %vm144_vm8 = vmor %vm142_vm7, %vm143_vm6 }
 0x2eb   :  { %v139_v46 = vsub.f32 1.0, %v138_v45 }
 0x2ed   :  { %v140_v47 = vmul.f32 %v624_v44, %v139_v46 }
 0x2ef   :  { %v141_v48 = vadd.f32 %v624_v44, %v140_v47 }
 0x2f1   :  { %v145_v51 = vsel %vm144_vm8, %v624_v44, %v141_v48 }
 0x2f2   :  { %v150_v54 = vsel %vm147_vm9, %v149_v52, %v145_v51 }
 0x2f3   :  { %v153_v56 = vmul.f32 %v150_v54, %v103_v30 }
 0x338   :  { %v156_v53 = vpop.permute.xlu2 %155 }
 0x339   :  { %v158_v55 = vmul.f32 %v156_v53, %v150_v54 }
 0x33b   :  { %160 = vrot.lane.b32.xlu0 %v158_v55, %s727_s26 }
 0x3ad   :  { %v161_v57 = vpop.permute.xlu0 %160 }
 0x3ae   :  { %v163_v58 = vadd.f32 %v161_v57, %v153_v56  ;;  %v592_v56 = vld [vmem:[%s849_s0 + $0x10] sm:$0xf] }
 0x3b0   :  { %625 = vtanh.f32 %v163_v58 }
 0x3b6   :  { %v626_v59 = vpop.eup %625 }
 0x3b7   :  { %166 = vrot.lane.b32.xlu1 %v626_v59, %s727_s26 }
 0x429   :  { %v167_v60 = vpop.permute.xlu1 %166 }
 0x42a   :  { %v169_v61 = vmul.f32 %v167_v60, %v150_v54 }
 0x42c   :  { %v172_v62 = vpack.c.bf16 %v169_v61, %v169_v61 }
 0x42e   :  { %174 = vrot.lane.b32.xlu2 %v172_v62, %s728_s2 }
 0x488   :  { %v175_v63 = vpop.permute.xlu2 %174 }
 0x489   :  { %587 = vmatmul.msk.bf16.vlgmr.msra.gmra.mxu2 %vm51_vm1, %v175_v63 }
 0x50c   :  { %v188_v1 = vpop.f32.mrf.mxu2 }
 0x50d   :  { %v192_v2 = vadd.f32 %v586_v0, %v188_v1 }
 0x50f   :  { %627 = vtanh.f32 %v192_v2  ;;  %v588_v5 = vmul.f32 -1.442695, %v192_v2 }
 0x511   :  { %629 = vpow2.f32 %v588_v5 }
 0x514   :  { %v190_v3 = vpop.f32.mrf.mxu2 }
 0x515   :  { %v628_v4 = vpop.eup %627 }
 0x516   :  { %215 = vrot.lane.b32.xlu0 %v628_v4, %s727_s26 }
 0x517   :  { %v630_v6 = vpop.eup %629 }
 0x518   :  { %v196_v7 = vadd.f32 1.0, %v630_v6 }
 0x51a   :  { %631 = vrcp.f32 %v196_v7  ;;  %v208_v13 = vand.u32 2147483648, %v196_v7  ;;  %vm202_vm11 = vweird.f32 %v196_v7  ;;  %v206_v14 = vand.u32 2147483647, %v196_v7 }
 0x51c   :  { %v209_v16 = vor.u32 1.1754944e-38, %v208_v13  ;;  %vm207_vm13 = vcmp.eq.f32.partialorder %v206_v14, 8.507059e+37 }
 0x520   :  { %v632_v8 = vpop.eup %631 }
 0x521   :  { %v198_v9 = vmul.f32 %v632_v8, %v196_v7  ;;  %vm203_vm10 = vweird.f32 %v632_v8 }
 0x522   :  { %vm204_vm12 = vmor %vm202_vm11, %vm203_vm10 }
 0x523   :  { %v199_v10 = vsub.f32 1.0, %v198_v9 }
 0x525   :  { %v200_v11 = vmul.f32 %v632_v8, %v199_v10 }
 0x527   :  { %v201_v12 = vadd.f32 %v632_v8, %v200_v11 }
 0x529   :  { %v205_v15 = vsel %vm204_vm12, %v632_v8, %v201_v12 }
 0x52a   :  { %v210_v18 = vsel %vm207_vm13, %v209_v16, %v205_v15 }
 0x52b   :  { %v213_v20 = vmul.f32 %v210_v18, %v163_v58 }
 0x588   :  { %v216_v17 = vpop.permute.xlu0 %215 }
 0x589   :  { %v218_v19 = vmul.f32 %v216_v17, %v210_v18 }
 0x58b   :  { %220 = vrot.lane.b32.xlu1 %v218_v19, %s727_s26 }
 0x5fd   :  { %v221_v21 = vpop.permute.xlu1 %220 }
 0x5fe   :  { %v223_v22 = vadd.f32 %v221_v21, %v213_v20  ;;  %v595_v20 = vld [vmem:[%s849_s0 + $0x14] sm:$0xf] }
 0x600   :  { %633 = vtanh.f32 %v223_v22 }
 0x606   :  { %v634_v23 = vpop.eup %633 }
 0x607   :  { %226 = vrot.lane.b32.xlu2 %v634_v23, %s727_s26 }
 0x661   :  { %v227_v24 = vpop.permute.xlu2 %226 }
 0x662   :  { %v229_v25 = vmul.f32 %v227_v24, %v210_v18 }
 0x664   :  { %v232_v26 = vpack.c.bf16 %v229_v25, %v229_v25 }
 0x666   :  { %234 = vrot.lane.b32.xlu0 %v232_v26, %s728_s2 }
 0x6d8   :  { %v235_v27 = vpop.permute.xlu0 %234 }
 0x6d9   :  { %590 = vmatmul.msk.bf16.vlgmr.msra.gmra.mxu3 %vm51_vm1, %v235_v27 }
 0x75c   :  { %v248_v29 = vpop.f32.mrf.mxu3 }
 0x75d   :  { %v252_v30 = vadd.f32 %v589_v28, %v248_v29 }
 0x75f   :  { %635 = vtanh.f32 %v252_v30  ;;  %v591_v33 = vmul.f32 -1.442695, %v252_v30 }
 0x761   :  { %637 = vpow2.f32 %v591_v33 }
 0x764   :  { %v250_v31 = vpop.f32.mrf.mxu3 }
 0x765   :  { %v636_v32 = vpop.eup %635 }
 0x766   :  { %275 = vrot.lane.b32.xlu1 %v636_v32, %s727_s26 }
 0x767   :  { %v638_v34 = vpop.eup %637 }
 0x768   :  { %v256_v35 = vadd.f32 1.0, %v638_v34 }
 0x76a   :  { %639 = vrcp.f32 %v256_v35  ;;  %v268_v41 = vand.u32 2147483648, %v256_v35  ;;  %vm262_vm15 = vweird.f32 %v256_v35  ;;  %v266_v42 = vand.u32 2147483647, %v256_v35 }
 0x76c   :  { %v269_v44 = vor.u32 1.1754944e-38, %v268_v41  ;;  %vm267_vm3 = vcmp.eq.f32.partialorder %v266_v42, 8.507059e+37 }
 0x770   :  { %v640_v36 = vpop.eup %639 }
 0x771   :  { %v258_v37 = vmul.f32 %v640_v36, %v256_v35  ;;  %vm263_vm14 = vweird.f32 %v640_v36 }
 0x772   :  { %vm264_vm2 = vmor %vm262_vm15, %vm263_vm14 }
 0x773   :  { %v259_v38 = vsub.f32 1.0, %v258_v37 }
 0x775   :  { %v260_v39 = vmul.f32 %v640_v36, %v259_v38 }
 0x777   :  { %v261_v40 = vadd.f32 %v640_v36, %v260_v39 }
 0x779   :  { %v265_v43 = vsel %vm264_vm2, %v640_v36, %v261_v40 }
 0x77a   :  { %v270_v46 = vsel %vm267_vm3, %v269_v44, %v265_v43 }
 0x77b   :  { %v273_v48 = vmul.f32 %v270_v46, %v223_v22 }
 0x7d8   :  { %v276_v45 = vpop.permute.xlu1 %275 }
 0x7d9   :  { %v278_v47 = vmul.f32 %v276_v45, %v270_v46 }
 0x7db   :  { %280 = vrot.lane.b32.xlu2 %v278_v47, %s727_s26 }
 0x835   :  { %v281_v49 = vpop.permute.xlu2 %280 }
 0x836   :  { %v283_v50 = vadd.f32 %v281_v49, %v273_v48  ;;  %v598_v48 = vld [vmem:[%s849_s0 + $0x18] sm:$0xf] }
 0x838   :  { %641 = vtanh.f32 %v283_v50 }
 0x83e   :  { %v642_v51 = vpop.eup %641 }
 0x83f   :  { %286 = vrot.lane.b32.xlu0 %v642_v51, %s727_s26 }
 0x8b1   :  { %v287_v52 = vpop.permute.xlu0 %286 }
 0x8b2   :  { %v289_v53 = vmul.f32 %v287_v52, %v270_v46 }
 0x8b4   :  { %v292_v54 = vpack.c.bf16 %v289_v53, %v289_v53 }
 0x8b6   :  { %294 = vrot.lane.b32.xlu1 %v292_v54, %s728_s2 }
 0x928   :  { %v295_v55 = vpop.permute.xlu1 %294 }
 0x929   :  { %593 = vmatmul.msk.bf16.vlgmr.msrb.gmra.mxu0 %vm51_vm1, %v295_v55 }
 0x9a6   :  { %v308_v57 = vpop.f32.mrf.mxu0 }
 0x9a7   :  { %v312_v58 = vadd.f32 %v592_v56, %v308_v57 }
 0x9a9   :  { %643 = vtanh.f32 %v312_v58  ;;  %v594_v61 = vmul.f32 -1.442695, %v312_v58 }
 0x9ab   :  { %645 = vpow2.f32 %v594_v61 }
 0x9ae   :  { %v310_v59 = vpop.f32.mrf.mxu0 }
 0x9af   :  { %v644_v60 = vpop.eup %643 }
 0x9b0   :  { %335 = vrot.lane.b32.xlu2 %v644_v60, %s727_s26 }
 0x9b1   :  { %v646_v62 = vpop.eup %645 }
 0x9b2   :  { %v316_v63 = vadd.f32 1.0, %v646_v62 }
 0x9b4   :  { %647 = vrcp.f32 %v316_v63  ;;  %v328_v5 = vand.u32 2147483648, %v316_v63  ;;  %vm322_vm5 = vweird.f32 %v316_v63  ;;  %v326_v6 = vand.u32 2147483647, %v316_v63 }
 0x9b6   :  { %v329_v8 = vor.u32 1.1754944e-38, %v328_v5  ;;  %vm327_vm7 = vcmp.eq.f32.partialorder %v326_v6, 8.507059e+37 }
 0x9ba   :  { %v648_v0 = vpop.eup %647 }
 0x9bb   :  { %v318_v1 = vmul.f32 %v648_v0, %v316_v63  ;;  %vm323_vm4 = vweird.f32 %v648_v0 }
 0x9bc   :  { %vm324_vm6 = vmor %vm322_vm5, %vm323_vm4 }
 0x9bd   :  { %v319_v2 = vsub.f32 1.0, %v318_v1 }
 0x9bf   :  { %v320_v3 = vmul.f32 %v648_v0, %v319_v2 }
 0x9c1   :  { %v321_v4 = vadd.f32 %v648_v0, %v320_v3 }
 0x9c3   :  { %v325_v7 = vsel %vm324_vm6, %v648_v0, %v321_v4 }
 0x9c4   :  { %v330_v10 = vsel %vm327_vm7, %v329_v8, %v325_v7 }
 0x9c5   :  { %v333_v12 = vmul.f32 %v330_v10, %v283_v50 }
 0xa0a   :  { %v336_v9 = vpop.permute.xlu2 %335 }
 0xa0b   :  { %v338_v11 = vmul.f32 %v336_v9, %v330_v10 }
 0xa0d   :  { %340 = vrot.lane.b32.xlu0 %v338_v11, %s727_s26 }
 0xa7f   :  { %v341_v13 = vpop.permute.xlu0 %340 }
 0xa80   :  { %v343_v14 = vadd.f32 %v341_v13, %v333_v12  ;;  %v601_v12 = vld [vmem:[%s849_s0 + $0x1c] sm:$0xf]  ;;  %s729_s0 = smov 96  }
 0xa82   :  { %649 = vtanh.f32 %v343_v14 }
 0xa88   :  { %v650_v15 = vpop.eup %649 }
 0xa89   :  { %346 = vrot.lane.b32.xlu1 %v650_v15, %s727_s26 }
 0xafb   :  { %v347_v16 = vpop.permute.xlu1 %346 }
 0xafc   :  { %v349_v17 = vmul.f32 %v347_v16, %v330_v10 }
 0xafe   :  { %v352_v18 = vpack.c.bf16 %v349_v17, %v349_v17 }
 0xb00   :  { %354 = vrot.lane.b32.xlu2 %v352_v18, %s728_s2 }
 0xb5a   :  { %v355_v19 = vpop.permute.xlu2 %354 }
 0xb5b   :  { %596 = vmatmul.msk.bf16.vlgmr.msrb.gmra.mxu1 %vm51_vm1, %v355_v19 }
 0xbd8   :  { %v368_v21 = vpop.f32.mrf.mxu1 }
 0xbd9   :  { %v372_v22 = vadd.f32 %v595_v20, %v368_v21 }
 0xbdb   :  { %651 = vtanh.f32 %v372_v22  ;;  %v597_v25 = vmul.f32 -1.442695, %v372_v22 }
 0xbdd   :  { %653 = vpow2.f32 %v597_v25 }
 0xbe0   :  { %v370_v23 = vpop.f32.mrf.mxu1 }
 0xbe1   :  { %v652_v24 = vpop.eup %651 }
 0xbe2   :  { %395 = vrot.lane.b32.xlu0 %v652_v24, %s727_s26 }
 0xbe3   :  { %v654_v26 = vpop.eup %653 }
 0xbe4   :  { %v376_v27 = vadd.f32 1.0, %v654_v26 }
 0xbe6   :  { %655 = vrcp.f32 %v376_v27  ;;  %v388_v33 = vand.u32 2147483648, %v376_v27  ;;  %vm382_vm9 = vweird.f32 %v376_v27  ;;  %v386_v34 = vand.u32 2147483647, %v376_v27 }
 0xbe8   :  { %v389_v36 = vor.u32 1.1754944e-38, %v388_v33  ;;  %vm387_vm11 = vcmp.eq.f32.partialorder %v386_v34, 8.507059e+37 }
 0xbec   :  { %v656_v28 = vpop.eup %655 }
 0xbed   :  { %v378_v29 = vmul.f32 %v656_v28, %v376_v27  ;;  %vm383_vm8 = vweird.f32 %v656_v28 }
 0xbee   :  { %vm384_vm10 = vmor %vm382_vm9, %vm383_vm8 }
 0xbef   :  { %v379_v30 = vsub.f32 1.0, %v378_v29 }
 0xbf1   :  { %v380_v31 = vmul.f32 %v656_v28, %v379_v30 }
 0xbf3   :  { %v381_v32 = vadd.f32 %v656_v28, %v380_v31 }
 0xbf5   :  { %v385_v35 = vsel %vm384_vm10, %v656_v28, %v381_v32 }
 0xbf6   :  { %v390_v38 = vsel %vm387_vm11, %v389_v36, %v385_v35 }
 0xbf7   :  { %v393_v40 = vmul.f32 %v390_v38, %v343_v14 }
 0xc54   :  { %v396_v37 = vpop.permute.xlu0 %395 }
 0xc55   :  { %v398_v39 = vmul.f32 %v396_v37, %v390_v38 }
 0xc57   :  { %400 = vrot.lane.b32.xlu1 %v398_v39, %s727_s26 }
 0xcc9   :  { %v401_v41 = vpop.permute.xlu1 %400 }
 0xcca   :  { %v403_v42 = vadd.f32 %v401_v41, %v393_v40 }
 0xccc   :  { %657 = vtanh.f32 %v403_v42 }
 0xcd2   :  { %v658_v43 = vpop.eup %657 }
 0xcd3   :  { %406 = vrot.lane.b32.xlu2 %v658_v43, %s727_s26 }
 0xd2d   :  { %v407_v44 = vpop.permute.xlu2 %406 }
 0xd2e   :  { %v409_v45 = vmul.f32 %v407_v44, %v390_v38 }
 0xd30   :  { %v412_v46 = vpack.c.bf16 %v409_v45, %v409_v45 }
 0xd32   :  { %414 = vrot.lane.b32.xlu0 %v412_v46, %s728_s2 }
 0xda4   :  { %v415_v47 = vpop.permute.xlu0 %414 }
 0xda5   :  { %599 = vmatmul.msk.bf16.vlgmr.msrb.gmra.mxu2 %vm51_vm1, %v415_v47 }
 0xe28   :  { %v428_v49 = vpop.f32.mrf.mxu2 }
 0xe29   :  { %v432_v50 = vadd.f32 %v598_v48, %v428_v49 }
 0xe2b   :  { %659 = vtanh.f32 %v432_v50  ;;  %v600_v53 = vmul.f32 -1.442695, %v432_v50 }
 0xe2d   :  { %661 = vpow2.f32 %v600_v53 }
 0xe30   :  { %v430_v51 = vpop.f32.mrf.mxu2 }
 0xe31   :  { %v660_v52 = vpop.eup %659 }
 0xe32   :  { %455 = vrot.lane.b32.xlu1 %v660_v52, %s727_s26 }
 0xe33   :  { %v662_v54 = vpop.eup %661 }
 0xe34   :  { %v436_v55 = vadd.f32 1.0, %v662_v54 }
 0xe36   :  { %663 = vrcp.f32 %v436_v55  ;;  %v448_v61 = vand.u32 2147483648, %v436_v55  ;;  %vm442_vm13 = vweird.f32 %v436_v55  ;;  %v446_v62 = vand.u32 2147483647, %v436_v55 }
 0xe38   :  { %v449_v0 = vor.u32 1.1754944e-38, %v448_v61  ;;  %vm447_vm15 = vcmp.eq.f32.partialorder %v446_v62, 8.507059e+37 }
 0xe3c   :  { %v664_v56 = vpop.eup %663 }
 0xe3d   :  { %v438_v57 = vmul.f32 %v664_v56, %v436_v55  ;;  %vm443_vm12 = vweird.f32 %v664_v56 }
 0xe3e   :  { %vm444_vm14 = vmor %vm442_vm13, %vm443_vm12 }
 0xe3f   :  { %v439_v58 = vsub.f32 1.0, %v438_v57 }
 0xe41   :  { %v440_v59 = vmul.f32 %v664_v56, %v439_v58 }
 0xe43   :  { %v441_v60 = vadd.f32 %v664_v56, %v440_v59 }
 0xe45   :  { %v445_v63 = vsel %vm444_vm14, %v664_v56, %v441_v60 }
 0xe46   :  { %v450_v2 = vsel %vm447_vm15, %v449_v0, %v445_v63 }
 0xe47   :  { %v453_v4 = vmul.f32 %v450_v2, %v403_v42 }
 0xea4   :  { %v456_v1 = vpop.permute.xlu1 %455 }
 0xea5   :  { %v458_v3 = vmul.f32 %v456_v1, %v450_v2 }
 0xea7   :  { %460 = vrot.lane.b32.xlu2 %v458_v3, %s727_s26 }
 0xf01   :  { %v461_v5 = vpop.permute.xlu2 %460 }
 0xf02   :  { %v463_v6 = vadd.f32 %v461_v5, %v453_v4 }
 0xf04   :  { %665 = vtanh.f32 %v463_v6 }
 0xf0a   :  { %v666_v7 = vpop.eup %665 }
 0xf0b   :  { %466 = vrot.lane.b32.xlu0 %v666_v7, %s727_s26 }
 0xf7d   :  { %v467_v8 = vpop.permute.xlu0 %466 }
 0xf7e   :  { %v469_v9 = vmul.f32 %v467_v8, %v450_v2 }
 0xf80   :  { %v472_v10 = vpack.c.bf16 %v469_v9, %v469_v9 }
 0xf82   :  { %474 = vrot.lane.b32.xlu1 %v472_v10, %s728_s2 }
 0xff4   :  { %v475_v11 = vpop.permute.xlu1 %474 }
 0xff5   :  { %602 = vmatmul.msk.bf16.vlgmr.msrb.gmra.mxu3 %vm51_vm1, %v475_v11 }
0x1078   :  { %v488_v13 = vpop.f32.mrf.mxu3 }
0x1079   :  { %v492_v14 = vadd.f32 %v601_v12, %v488_v13 }
0x107b   :  { %667 = vtanh.f32 %v492_v14  ;;  %v603_v17 = vmul.f32 -1.442695, %v492_v14 }
0x107d   :  { %669 = vpow2.f32 %v603_v17 }
0x1080   :  { %v490_v15 = vpop.f32.mrf.mxu3 }
0x1081   :  { %v668_v16 = vpop.eup %667 }
0x1082   :  { %515 = vrot.lane.b32.xlu2 %v668_v16, %s727_s26 }
0x1083   :  { %v670_v18 = vpop.eup %669 }
0x1084   :  { %v496_v19 = vadd.f32 1.0, %v670_v18 }
0x1086   :  { %671 = vrcp.f32 %v496_v19  ;;  %v508_v25 = vand.u32 2147483648, %v496_v19  ;;  %vm502_vm2 = vweird.f32 %v496_v19  ;;  %v506_v26 = vand.u32 2147483647, %v496_v19 }
0x1088   :  { %v509_v28 = vor.u32 1.1754944e-38, %v508_v25  ;;  %vm507_vm4 = vcmp.eq.f32.partialorder %v506_v26, 8.507059e+37 }
0x108c   :  { %v672_v20 = vpop.eup %671 }
0x108d   :  { %v498_v21 = vmul.f32 %v672_v20, %v496_v19  ;;  %vm503_vm1 = vweird.f32 %v672_v20 }
0x108e   :  { %vm504_vm3 = vmor %vm502_vm2, %vm503_vm1 }
0x108f   :  { %v499_v22 = vsub.f32 1.0, %v498_v21 }
0x1091   :  { %v500_v23 = vmul.f32 %v672_v20, %v499_v22 }
0x1093   :  { %v501_v24 = vadd.f32 %v672_v20, %v500_v23 }
0x1095   :  { %v505_v27 = vsel %vm504_vm3, %v672_v20, %v501_v24 }
0x1096   :  { %v510_v30 = vsel %vm507_vm4, %v509_v28, %v505_v27 }
0x1097   :  { %v513_v32 = vmul.f32 %v510_v30, %v463_v6 }
0x10dc   :  { %v516_v29 = vpop.permute.xlu2 %515 }
0x10dd   :  { %v518_v31 = vmul.f32 %v516_v29, %v510_v30 }
0x10df   :  { %520 = vrot.lane.b32.xlu0 %v518_v31, %s727_s26 }
0x1151   :  { %v521_v33 = vpop.permute.xlu0 %520 }
0x1152   :  { %v523_v34 = vadd.f32 %v521_v33, %v513_v32 }
0x1154   :  { %673 = vtanh.f32 %v523_v34  ;;  %537 = vrot.lane.b32.xlu0 %v523_v34, %s729_s0 }
0x115a   :  { %v674_v35 = vpop.eup %673 }
0x115b   :  { %526 = vrot.lane.b32.xlu1 %v674_v35, %s727_s26 }
0x11c6   :  { %v538_v36 = vpop.permute.xlu0 %537 }
0x11c7   :  { %540 = vst.msk [vmem:[#allocation4] sm:$0xf] %vm27_vm0, %v538_v36 }
0x11c8   :  { %562 = dma.vmem_to_hbm [thread:$0]  %s558_s17, 64, %s560_s20, [#allocation5]  }
0x11cd   :  { %v527_v37 = vpop.permute.xlu1 %526 }
0x11ce   :  { %v529_v38 = vmul.f32 %v527_v37, %v510_v30 }
0x11d0   :  { %531 = vrot.lane.b32.xlu2 %v529_v38, %s728_s2 }
0x122a   :  { %v532_v39 = vpop.permute.xlu2 %531 }
0x122b   :  { %535 = vst.msk [vmem:[#allocation2] sm:$0xf] %vm27_vm0, %v532_v39 }
0x122c   :  { %551 = dma.vmem_to_hbm [thread:$0]  %s547_s22, 64, %s549_s3, [#allocation3]  }
0x122d   :  { %723 = dma.done.wait [#allocation3], 64  }
0x122e   :  { %724 = vsyncadd [#allocation3], 4294967232 }
0x122f   :  { %725 = dma.done.wait [#allocation5], 64  }
0x1230   :  { %726 = vsyncadd [#allocation5], 4294967232 }
0x1231   :  { %571 = vsyncpa [#allocation3], 1 }
0x1232   :  { %572 = vsyncpa [#allocation5], 1 }

</bundles_post_ra>
